<compile_context>
chip_gen: v7x
topology: tpu7x:2x2x1
jax: 0.10.0
libtpu: 0.0.40
codegen_flags: <defaults>
</compile_context>

<pallas_src>
import functools
import math

import jax
import jax.numpy as jnp
from jax import lax
from jax.experimental import pallas as pl
from jax.experimental.pallas import tpu as pltpu

_PI = 3.14159265  # the constant used by the PyTorch module

# Chebyshev polynomials cos(m*theta) as a function of c = cos(theta) (mlambda[m]).
_MLAMBDA = {
    1: lambda c: c,
    2: lambda c: 2.0 * c * c - 1.0,
    3: lambda c: (4.0 * c * c - 3.0) * c,
    4: lambda c: (8.0 * c * c - 8.0) * (c * c) + 1.0,
    5: lambda c: ((16.0 * c * c - 20.0) * (c * c) + 5.0) * c,
}


def _round_up(x, n):
    return (x + n - 1) // n * n


def _select_tiles(b, c, d, w_itemsize, budget_bytes=40 * (1 << 20)):
    """Largest (tm, tn) tiles keeping double-buffered VMEM under budget."""
    tm = min(256, _round_up(b, 8))
    tn = min(512, _round_up(c, 128))

    def need(tm_, tn_):
        # 2x for BlockSpec double buffering of each input and both f32 outputs.
        return 2 * (tm_ * d * 4 + d * tn_ * w_itemsize + 2 * tm_ * tn_ * 4)

    while need(tm, tn) > budget_bytes and (tm > 8 or tn > 128):
        if tn > 128:
            tn = max(128, (tn // 2) // 128 * 128)
        else:
            tm = max(8, _round_up(tm // 2, 8))
    return tm, tn, need(tm, tn)


def _angle_linear_kernel(x_ref, w_ref, cos_ref, phi_ref, *, m, thresholds):
    x = x_ref[...]                                    # [tm, D]  float32
    w = w_ref[...]                                    # [D, tn]  f32/bf16, unit-norm cols

    # Row norms via rsqrt (EUP slot) — no f32 divides anywhere in the kernel.
    sumsq = jnp.sum(x * x, axis=1, keepdims=True)     # [tm, 1]
    inv_xlen = lax.rsqrt(sumsq + 1e-12)
    xlen = sumsq * inv_xlen                           # == sqrt(sumsq)

    # MXU: x @ w_unit == |x| * cos_theta  (weight columns are unit L2 norm).
    dot = jnp.dot(x.astype(w.dtype), w, preferred_element_type=jnp.float32)
    cos_theta = jnp.clip(dot * inv_xlen, -1.0, 1.0)   # [tm, tn]

    cos_m_theta = _MLAMBDA[m](cos_theta)              # cos(m * theta)

    # k = floor(m * acos(c) / pi) via monotone thresholds:
    #   theta >= j*pi/m  <=>  c <= cos(j*pi/m).   (-1)^k from the int parity bit.
    k = jnp.zeros(cos_theta.shape, jnp.int32)
    for thr in thresholds:
        k = k + (cos_theta <= thr).astype(jnp.int32)
    sign = jnp.where((k & 1) == 0, 1.0, -1.0)
    phi_theta = sign * cos_m_theta - 2.0 * k.astype(jnp.float32)

    cos_ref[...] = cos_theta * xlen
    phi_ref[...] = phi_theta * xlen


def angle_linear(x, weight, *, m=4, matmul_dtype=jnp.float32):
    """SphereFace AngleLinear forward (phiflag=True).

    x:      [batch, in_features]
    weight: [in_features, out_features]
    Returns (cos_theta * |x|, phi_theta * |x|), both [batch, out_features] f32.
    Use matmul_dtype=jnp.bfloat16 for the fast MXU path on v6e/v7x.
    """
    assert m in _MLAMBDA, f"unsupported margin m={m}"
    b, d = x.shape
    d2, c = weight.shape
    assert d == d2

    x32 = x.astype(jnp.float32)
    w32 = weight.astype(jnp.float32)

    # ---- one-shot column renorm pre-pass (plain JAX, O(D*C), done once) ----
    # PyTorch: ww = w.renorm(2,1,1e-5)*1e5; wlen = |ww_col|; later divides by
    # wlen.  Analytically ww/wlen == w/|w_col|, so fold a single per-column
    # rsqrt factor into the matmul operand instead of materializing ww and
    # re-reducing it.
    col_sumsq = jnp.sum(w32 * w32, axis=0, keepdims=True)
    w_unit = w32 * lax.rsqrt(col_sumsq + 1e-12)       # [D, C], unit-norm columns

    w_itemsize = jnp.dtype(matmul_dtype).itemsize
    tm, tn, vmem_need = _select_tiles(b, c, d, w_itemsize)
    b_pad = _round_up(b, tm)
    c_pad = _round_up(c, tn)

    x_p = jnp.pad(x32, ((0, b_pad - b), (0, 0)))
    w_p = jnp.pad(w_unit, ((0, 0), (0, c_pad - c))).astype(matmul_dtype)

    thresholds = tuple(math.cos(j * _PI / m) for j in range(1, m + 1))
    kernel = functools.partial(_angle_linear_kernel, m=m, thresholds=thresholds)

    grid = (b_pad // tm, c_pad // tn)
    out_shape = (jax.ShapeDtypeStruct((b_pad, c_pad), jnp.float32),
                 jax.ShapeDtypeStruct((b_pad, c_pad), jnp.float32))
    vmem_limit = int(min(max(2 * vmem_need, 32 * (1 << 20)), 48 * (1 << 20)))

    cos_out, phi_out = pl.pallas_call(
        kernel,
        out_shape=out_shape,
        grid=grid,
        in_specs=[
            pl.BlockSpec((tm, d), lambda i, j: (i, 0)),   # x tile
            pl.BlockSpec((d, tn), lambda i, j: (0, j)),   # unit-norm weight tile
        ],
        out_specs=(
            pl.BlockSpec((tm, tn), lambda i, j: (i, j)),
            pl.BlockSpec((tm, tn), lambda i, j: (i, j)),
        ),
        compiler_params=pltpu.CompilerParams(
            dimension_semantics=("parallel", "parallel"),
            vmem_limit_bytes=vmem_limit,
        ),
    )(x_p, w_p)

    return cos_out[:b, :c], phi_out[:b, :c]


if __name__ == "__main__":
    batch, in_features, out_features = 8, 32, 16
    key = jax.random.PRNGKey(0)
    kx, kw = jax.random.split(key)
    x = jax.random.normal(kx, (batch, in_features), dtype=jnp.float32)
    # init.normal_(weight, std=0.001), shape (in_features, out_features)
    weight = 0.001 * jax.random.normal(kw, (in_features, out_features),
                                       dtype=jnp.float32)

    # f32 MXU path (faithful to the PyTorch forward).
    cos_out, phi_out = angle_linear(x, weight)
    jax.block_until_ready((cos_out, phi_out))

    # ---- plain-JAX reference of the exact PyTorch sequence ----
    col_norm = jnp.sqrt(jnp.sum(weight * weight, axis=0, keepdims=True))
    scale = jnp.where(col_norm > 1e-5, 1e-5 / (col_norm + 1e-7), 1.0)
    ww = weight * scale * 1e5
    xlen = jnp.sqrt(jnp.sum(x * x, axis=1, keepdims=True))
    wlen = jnp.sqrt(jnp.sum(ww * ww, axis=0, keepdims=True))
    c_ref = jnp.clip((x @ ww) / xlen / wlen, -1.0, 1.0)
    cmt = 8.0 * c_ref ** 4 - 8.0 * c_ref ** 2 + 1.0
    k_ref = jnp.floor(4.0 * jnp.arccos(c_ref) / _PI)
    phi_ref = jnp.where(jnp.mod(k_ref, 2.0) == 0.0, 1.0, -1.0) * cmt - 2.0 * k_ref
    cos_ref = c_ref * xlen
    phi_ref = phi_ref * xlen

    assert jnp.allclose(cos_out, cos_ref, atol=1e-4, rtol=1e-4), "cos mismatch"

    # phi is piecewise in k; exclude elements sitting essentially on a bucket
    # boundary, where floor(m*acos(c)/pi) vs the threshold count can legitimately
    # differ by one bucket under f32 rounding.
    thr = jnp.array([math.cos(j * _PI / 4) for j in range(1, 5)], jnp.float32)
    dist = jnp.min(jnp.abs(c_ref[..., None] - thr), axis=-1)
    safe = dist > 1e-3
    phi_close = jnp.abs(phi_out - phi_ref) <= (1e-3 + 1e-3 * jnp.abs(phi_ref))
    assert bool(jnp.all(phi_close | ~safe)), "phi mismatch"

    # bf16 MXU fast path (v6e/v7x): looser check on the continuous output only.
    cos_bf, phi_bf = angle_linear(x, weight, matmul_dtype=jnp.bfloat16)
    jax.block_until_ready((cos_bf, phi_bf))
    assert jnp.allclose(cos_bf, cos_ref, atol=5e-2, rtol=5e-2), "bf16 cos mismatch"

    print("KERNEL_OK")
</pallas_src>

<mosaic_0001>
module attributes {stable_mosaic.version = 11 : i64} {
  func.func @_angle_linear_kernel(%arg0: i32, %arg1: i32, %arg2: memref<8x32xf32, #tpu.memory_space<vmem>>, %arg3: memref<32x128xf32, #tpu.memory_space<vmem>>, %arg4: memref<8x128xf32, #tpu.memory_space<vmem>>, %arg5: memref<8x128xf32, #tpu.memory_space<vmem>>) attributes {dimension_semantics = [#tpu.dimension_semantics<parallel>, #tpu.dimension_semantics<parallel>], iteration_bounds = array<i64: 1, 1>, scalar_prefetch = 0 : i64, scratch_operands = 0 : i64, tpu.core_type = #tpu.core_type<tc>, window_params = [{transform_indices = @transform_0, window_bounds = array<i64: 8, 32>}, {transform_indices = @transform_1, window_bounds = array<i64: 32, 128>}, {transform_indices = @transform_2, window_bounds = array<i64: 8, 128>}, {transform_indices = @transform_3, window_bounds = array<i64: 8, 128>}]} {
    %c0 = arith.constant 0 : index
    %c0_0 = arith.constant 0 : index
    %0 = vector.load %arg2[%c0, %c0_0] : memref<8x32xf32, #tpu.memory_space<vmem>>, vector<8x32xf32>
    %c0_1 = arith.constant 0 : index
    %c0_2 = arith.constant 0 : index
    %1 = vector.load %arg3[%c0_1, %c0_2] : memref<32x128xf32, #tpu.memory_space<vmem>>, vector<32x128xf32>
    %2 = arith.mulf %0, %0 : vector<8x32xf32>
    %cst = arith.constant dense<0.000000e+00> : vector<8xf32>
    %3 = vector.multi_reduction <add>, %2, %cst [1] : vector<8x32xf32> to vector<8xf32>
    %4 = vector.shape_cast %3 : vector<8xf32> to vector<8x1xf32>
    %cst_3 = arith.constant 9.99999996E-13 : f32
    %5 = vector.broadcast %cst_3 : f32 to vector<8x1xf32>
    %6 = arith.addf %4, %5 : vector<8x1xf32>
    %7 = math.rsqrt %6 : vector<8x1xf32>
    %8 = arith.mulf %4, %7 : vector<8x1xf32>
    %cst_4 = arith.constant dense<0.000000e+00> : vector<8x128xf32>
    %9 = tpu.matmul %0, %1, %cst_4 {dimension_numbers = #tpu.dot_dimension_numbers<[1], [0], [0], [1], [0, 0, 1, 1], [], []>} : vector<8x32xf32>, vector<32x128xf32>, vector<8x128xf32> -> vector<8x128xf32>
    %10 = vector.broadcast %7 : vector<8x1xf32> to vector<8x128xf32>
    %11 = arith.mulf %9, %10 : vector<8x128xf32>
    %cst_5 = arith.constant -1.000000e+00 : f32
    %cst_6 = arith.constant 1.000000e+00 : f32
    %12 = vector.broadcast %cst_5 : f32 to vector<8x128xf32>
    %13 = arith.maximumf %12, %11 : vector<8x128xf32>
    %14 = vector.broadcast %cst_6 : f32 to vector<8x128xf32>
    %15 = arith.minimumf %14, %13 : vector<8x128xf32>
    %cst_7 = arith.constant 8.000000e+00 : f32
    %16 = vector.broadcast %cst_7 : f32 to vector<8x128xf32>
    %17 = arith.mulf %16, %15 : vector<8x128xf32>
    %18 = arith.mulf %17, %15 : vector<8x128xf32>
    %cst_8 = arith.constant 8.000000e+00 : f32
    %19 = vector.broadcast %cst_8 : f32 to vector<8x128xf32>
    %20 = arith.subf %18, %19 : vector<8x128xf32>
    %21 = arith.mulf %15, %15 : vector<8x128xf32>
    %22 = arith.mulf %20, %21 : vector<8x128xf32>
    %cst_9 = arith.constant 1.000000e+00 : f32
    %23 = vector.broadcast %cst_9 : f32 to vector<8x128xf32>
    %24 = arith.addf %22, %23 : vector<8x128xf32>
    %c0_i32 = arith.constant 0 : i32
    %25 = vector.broadcast %c0_i32 : i32 to vector<8x128xi32>
    %cst_10 = arith.constant 0.707106769 : f32
    %26 = vector.broadcast %cst_10 : f32 to vector<8x128xf32>
    %27 = arith.cmpf ole, %15, %26 : vector<8x128xf32>
    %28 = arith.extui %27 : vector<8x128xi1> to vector<8x128xi32>
    %29 = arith.addi %25, %28 : vector<8x128xi32>
    %cst_11 = arith.constant 1.79489656E-9 : f32
    %30 = vector.broadcast %cst_11 : f32 to vector<8x128xf32>
    %31 = arith.cmpf ole, %15, %30 : vector<8x128xf32>
    %32 = arith.extui %31 : vector<8x128xi1> to vector<8x128xi32>
    %33 = arith.addi %29, %32 : vector<8x128xi32>
    %cst_12 = arith.constant -0.707106769 : f32
    %34 = vector.broadcast %cst_12 : f32 to vector<8x128xf32>
    %35 = arith.cmpf ole, %15, %34 : vector<8x128xf32>
    %36 = arith.extui %35 : vector<8x128xi1> to vector<8x128xi32>
    %37 = arith.addi %33, %36 : vector<8x128xi32>
    %cst_13 = arith.constant -1.000000e+00 : f32
    %38 = vector.broadcast %cst_13 : f32 to vector<8x128xf32>
    %39 = arith.cmpf ole, %15, %38 : vector<8x128xf32>
    %40 = arith.extui %39 : vector<8x128xi1> to vector<8x128xi32>
    %41 = arith.addi %37, %40 : vector<8x128xi32>
    %c1_i32 = arith.constant 1 : i32
    %42 = vector.broadcast %c1_i32 : i32 to vector<8x128xi32>
    %43 = arith.andi %41, %42 : vector<8x128xi32>
    %c0_i32_14 = arith.constant 0 : i32
    %44 = vector.broadcast %c0_i32_14 : i32 to vector<8x128xi32>
    %45 = arith.cmpi eq, %43, %44 : vector<8x128xi32>
    %cst_15 = arith.constant 1.000000e+00 : f32
    %cst_16 = arith.constant -1.000000e+00 : f32
    %46 = vector.broadcast %cst_15 : f32 to vector<8x128xf32>
    %47 = vector.broadcast %cst_16 : f32 to vector<8x128xf32>
    %48 = arith.select %45, %46, %47 : vector<8x128xi1>, vector<8x128xf32>
    %49 = arith.mulf %48, %24 : vector<8x128xf32>
    %50 = arith.sitofp %41 : vector<8x128xi32> to vector<8x128xf32>
    %cst_17 = arith.constant 2.000000e+00 : f32
    %51 = vector.broadcast %cst_17 : f32 to vector<8x128xf32>
    %52 = arith.mulf %51, %50 : vector<8x128xf32>
    %53 = arith.subf %49, %52 : vector<8x128xf32>
    %54 = vector.broadcast %8 : vector<8x1xf32> to vector<8x128xf32>
    %55 = arith.mulf %15, %54 : vector<8x128xf32>
    %c0_18 = arith.constant 0 : index
    %c0_19 = arith.constant 0 : index
    %56 = vector.load %arg4[%c0_18, %c0_19] : memref<8x128xf32, #tpu.memory_space<vmem>>, vector<8x128xf32>
    tpu.vector_store %arg4[%c0_18, %c0_19], %55 {strides = array<i32>} : memref<8x128xf32, #tpu.memory_space<vmem>>, vector<8x128xf32>,
    %57 = vector.broadcast %8 : vector<8x1xf32> to vector<8x128xf32>
    %58 = arith.mulf %53, %57 : vector<8x128xf32>
    %c0_20 = arith.constant 0 : index
    %c0_21 = arith.constant 0 : index
    %59 = vector.load %arg5[%c0_20, %c0_21] : memref<8x128xf32, #tpu.memory_space<vmem>>, vector<8x128xf32>
    tpu.vector_store %arg5[%c0_20, %c0_21], %58 {strides = array<i32>} : memref<8x128xf32, #tpu.memory_space<vmem>>, vector<8x128xf32>,
    return
  }
  func.func @transform_0(%arg0: i32, %arg1: i32) -> (i32, i32) {
    %c0_i32 = arith.constant 0 : i32
    %c0_i32_0 = arith.constant 0 : i32
    return %arg0, %c0_i32 : i32, i32
  }
  func.func @transform_1(%arg0: i32, %arg1: i32) -> (i32, i32) {
    %c0_i32 = arith.constant 0 : i32
    %c0_i32_0 = arith.constant 0 : i32
    return %c0_i32, %arg1 : i32, i32
  }
  func.func @transform_2(%arg0: i32, %arg1: i32) -> (i32, i32) {
    %c0_i32 = arith.constant 0 : i32
    return %arg0, %arg1 : i32, i32
  }
  func.func @transform_3(%arg0: i32, %arg1: i32) -> (i32, i32) {
    %c0_i32 = arith.constant 0 : i32
    return %arg0, %arg1 : i32, i32
  }
}

</mosaic_0001>

<bundles_post_ra>
// kernel: tpu_custom_call.1
= control target key start
LH: loop header
LB: loop body
LE: loop exit
PB: predicated region body
PF: predicated region fallthrough
CT: control target
= control target key end

     0   :  { %9 = vsyncpa [#allocation3], 0  ;;  %s409_s0 = inlined_call_operand.hbm [shape: f32[8,32], index: 0, kind: input, shape index: {}]   ;;  %s410_s1 = inlined_call_operand.hbm [shape: f32[32,128], index: 1, kind: input, shape index: {}]   ;;  %s411_s2 = inlined_call_operand.hbm [shape: f32[8,128], index: 2, kind: output, shape index: {0}]   ;;  %s412_s3 = inlined_call_operand.hbm [shape: f32[8,128], index: 3, kind: output, shape index: {1}]  }
   0x1   :  { %10 = vsyncpa [#allocation6], 0 }
   0x2   :  { %11 = vsyncpa [#allocation4], 0 }
   0x3   :  { %12 = vsyncpa [#allocation9], 0  ;;  %s322_s12 = smov [#allocation2]   ;;  %s323_s14 = smov [#allocation5]  }
   0x4   :  { %s19_s13 = sshll.u32 %s322_s12, 4  ;;  %s28_s15 = sshll.u32 %s323_s14, 4  ;;  %s20_s13 = int_to_ptr.vmem [resolvable:$true] %s19_s13  ;;  %s353_s15 = int_to_ptr.vmem [resolvable:$true] %s28_s15 }
   0x5   :  { %s226_s18 = scalar_lea.hbm %s409_s0, 128 }
   0x6   :  { %p227_p0 = scmp.ne.s32.totalorder %s409_s0, %s226_s18  ;;  %p230_p1 = scmp.lt.u32.totalorder %s226_s18, %s409_s0 }
   0x8   :  { %p232_p2 = pnand %p230_p1, %p227_p0 }
   0xa   :  { %235 = shalt.err (!%p232_p2)
}
   0xb   :  { %s236_s23 = scalar_lea.vmem %s20_s13, 128  ;;  %p241_p4 = scmp.lt.s32.totalorder %s20_s13, %s20_s13 }
   0xc   :  { %p237_p3 = scmp.ne.s32.totalorder %s20_s13, %s236_s23  ;;  %p242_p5 = scmp.lt.s32.totalorder %s236_s23, %s236_s23 }
   0xe   :  { %p243_p6 = por %p242_p5, %p241_p4 }
  0x10   :  { %p244_p7 = pnand %p243_p6, %p237_p3 }
  0x12   :  { %247 = shalt.err (!%p244_p7)
}
  0x13   :  { %22 = dma.hbm_to_vmem [thread:$0]  %s409_s0, 128, %s20_s13, [#allocation3]  }
  0x14   :  { %s248_s28 = scalar_lea.hbm %s410_s1, 512 }
  0x15   :  { %p249_p8 = scmp.ne.s32.totalorder %s410_s1, %s248_s28  ;;  %p252_p9 = scmp.lt.u32.totalorder %s248_s28, %s410_s1 }
  0x17   :  { %p254_p10 = pnand %p252_p9, %p249_p8 }
  0x19   :  { %257 = shalt.err (!%p254_p10)
}
  0x1a   :  { %s258_s6 = scalar_lea.vmem %s353_s15, 512  ;;  %p263_p12 = scmp.lt.s32.totalorder %s353_s15, %s353_s15 }
  0x1b   :  { %p259_p11 = scmp.ne.s32.totalorder %s353_s15, %s258_s6  ;;  %p264_p13 = scmp.lt.s32.totalorder %s258_s6, %s258_s6 }
  0x1d   :  { %p265_p0 = por %p264_p13, %p263_p12 }
  0x1f   :  { %p266_p1 = pnand %p265_p0, %p259_p11 }
  0x21   :  { %269 = shalt.err (!%p266_p1)
}
  0x22   :  { %s324_s0 = smov 128   ;;  %s325_s7 = smov 8  }
  0x23   :  { %34 = dma.hbm_to_vmem [thread:$0]  %s410_s1, 512, %s353_s15, [#allocation6], %s324_s0, %s324_s0, %s325_s7  }
  0x24   :  { %314 = dma.done.wait [#allocation3], 128  }
  0x25   :  { %315 = vsyncadd [#allocation3], 4294967168 }
  0x26   :  { %316 = dma.done.wait [#allocation6], 512  }
  0x27   :  { %317 = vsyncadd [#allocation6], 4294966784  ;;  %v326_v0 = vmov 0.0|0.0   ;;  %vm327_vm0 = vmmov 0   ;;  %v328_v1 = vmov 0.0   ;;  %v42_v2 = vld [vmem:[#allocation5] sm:$0xff] }
  0x28   :  { %207 = vmatprep.subr.bf16.mxu0 %v326_v0  ;;  %204 = vmatprep.mubr.msk.f32.mxu0 %vm327_vm0, %v328_v1  ;;  %v43_v3 = vld [vmem:[#allocation5 + $0x8] sm:$0xff]  ;;  %v44_v4 = vld [vmem:[#allocation5 + $0x10] sm:$0xff]  ;;  %v45_v6 = vld [vmem:[#allocation5 + $0x18] sm:$0xff]  ;;  %vm47_vm1 = vcmask 261120   ;;  %s329_s1 = smov [#allocation7]   ;;  %v330_v21 = vmov 0  }
  0x29   :  { %v208_v5 = vpack.c.bf16 %v43_v3, %v42_v2  ;;  %v41_v7 = vld [vmem:[#allocation2] sm:$0xff]  ;;  %v211_v9 = vpack.c.bf16 %v45_v6, %v44_v4  ;;  %s164_s10 = sshll.u32 %s329_s1, 4  ;;  %s165_s10 = int_to_ptr.vmem [resolvable:$true] %s164_s10 }
  0x2a   :  { %v46_v8 = vmul.f32 %v41_v7, %v41_v7  ;;  %s270_s11 = scalar_lea.vmem %s165_s10, 128  ;;  %p275_p3 = scmp.lt.s32.totalorder %s165_s10, %s165_s10 }
  0x2b   :  { %209 = vmatpush3.bf16.msra.mxu0 %v208_v5  ;;  %p271_p2 = scmp.ne.s32.totalorder %s165_s10, %s270_s11  ;;  %p276_p4 = scmp.lt.s32.totalorder %s270_s11, %s270_s11 }
  0x2c   :  { %210 = vmatprep.subr.bf16.mxu0 %v326_v0  ;;  %v48_v10 = vsel %vm47_vm1, %v46_v8, 0.0 }
  0x2d   :  { %49 = vadd.xlane.f32.xlu0 %v48_v10  ;;  %p277_p5 = por %p276_p4, %p275_p3 }
  0x2f   :  { %212 = vmatpush3.bf16.msra.mxu0 %v211_v9  ;;  %p278_p6 = pnand %p277_p5, %p271_p2 }
  0x32   :  { %205 = vmatmul.mubr.msk.f32.vlgmr.msra.gmra.mrb[0].mxu0 %vm47_vm1, %v41_v7 }
  0xba   :  { %v50_v11 = vpop.xlane.xlu0 %49 }
  0xbb   :  { %v51_v12 = vadd.f32 1e-12, %v50_v11 }
  0xbd   :  { %224 = vrsqrt.f32 %v51_v12 }
  0xc7   :  { %v225_v13 = vpop.eup %224 }
  0xc8   :  { %v53_v17 = vmul.f32 %v225_v13, %v50_v11 }
 0x105   :  { %v123_v14 = vpop.f32.mrb[0].mxu0 }
 0x106   :  { %v127_v15 = vmul.f32 %v225_v13, %v123_v14  ;;  %v206_v16 = vpop.f32.mrb[1].mxu0 }
 0x108   :  { %v189_v18 = vclamps-f32 %v127_v15, 1.0 }
 0x10a   :  { %v154_v19 = vmul.f32 %v189_v18, %v53_v17  ;;  %v130_v20 = vmul.f32 8.0, %v189_v18  ;;  %vm136_vm2 = vcmp.le.f32.partialorder %v189_v18, 0.70710677  ;;  %vm138_vm3 = vcmp.le.f32.partialorder %v189_v18, 1.7948966e-09 }
 0x10b   :  { %v137_v22 = vsel %vm136_vm2, 1, %v330_v21  ;;  %vm141_vm4 = vcmp.le.f32.partialorder %v189_v18, -0.70710677  ;;  %v139_v24 = vsel %vm138_vm3, 1, %v330_v21 }
 0x10c   :  { %155 = vst [vmem:[#allocation7] sm:$0xff] %v154_v19  ;;  %v131_v23 = vmul.f32 %v189_v18, %v130_v20 }
 0x10d   :  { %281 = shalt.err (!%p278_p6)
}
 0x10e   :  { %s282_s14 = scalar_lea.hbm %s411_s2, 128 }
 0x10f   :  { %p283_p7 = scmp.ne.s32.totalorder %s411_s2, %s282_s14  ;;  %p286_p8 = scmp.lt.u32.totalorder %s282_s14, %s411_s2 }
 0x111   :  { %p288_p9 = pnand %p286_p8, %p283_p7 }
 0x113   :  { %291 = shalt.err (!%p288_p9)
}
 0x114   :  { %167 = dma.vmem_to_hbm [thread:$0]  %s165_s10, 128, %s411_s2, [#allocation4]   ;;  %v140_v25 = vadd.s32 %v139_v24, %v137_v22  ;;  %vm144_vm5 = vcmp.le.f32.partialorder %v189_v18, -1.0  ;;  %v190_v26 = vadd.f32 -8.0, %v131_v23  ;;  %v142_v27 = vsel %vm141_vm4, 1, %v330_v21 }
 0x115   :  { %v133_v28 = vmul.f32 %v189_v18, %v189_v18  ;;  %v145_v30 = vsel %vm144_vm5, 1, %v330_v21  ;;  %v331_v36 = vmov -1.0   ;;  %s332_s21 = smov [#allocation8]  }
 0x116   :  { %v143_v29 = vadd.s32 %v142_v27, %v140_v25  ;;  %s174_s2 = sshll.u32 %s332_s21, 4  ;;  %s175_s2 = int_to_ptr.vmem [resolvable:$true] %s174_s2 }
 0x117   :  { %v134_v31 = vmul.f32 %v190_v26, %v133_v28  ;;  %s292_s22 = scalar_lea.vmem %s175_s2, 128  ;;  %p297_p11 = scmp.lt.s32.totalorder %s175_s2, %s175_s2 }
 0x118   :  { %v146_v32 = vadd.s32 %v145_v30, %v143_v29  ;;  %p293_p10 = scmp.ne.s32.totalorder %s175_s2, %s292_s22  ;;  %p298_p12 = scmp.lt.s32.totalorder %s292_s22, %s292_s22 }
 0x119   :  { %v135_v35 = vadd.f32 1.0, %v134_v31 }
 0x11a   :  { %v147_v33 = vand.u32 1, %v146_v32  ;;  %v151_v34 = vcvt.s32.f32 %v146_v32  ;;  %p299_p13 = por %p298_p12, %p297_p11 }
 0x11c   :  { %vm148_vm6 = vcmp.eq.s32.totalorder %v147_v33, 0  ;;  %v152_v39 = vmul.f32 2.0, %v151_v34  ;;  %p300_p0 = pnand %p299_p13, %p293_p10 }
 0x11d   :  { %v149_v37 = vsel %vm148_vm6, 1.0, %v331_v36 }
 0x11e   :  { %v150_v38 = vmul.f32 %v149_v37, %v135_v35 }
 0x120   :  { %v153_v40 = vsub.f32 %v150_v38, %v152_v39 }
 0x122   :  { %v156_v41 = vmul.f32 %v153_v40, %v53_v17 }
 0x124   :  { %157 = vst [vmem:[#allocation8] sm:$0xff] %v156_v41 }
 0x125   :  { %303 = shalt.err (!%p300_p0)
}
 0x126   :  { %s304_s25 = scalar_lea.hbm %s412_s3, 128 }
 0x127   :  { %p305_p1 = scmp.ne.s32.totalorder %s412_s3, %s304_s25  ;;  %p308_p2 = scmp.lt.u32.totalorder %s304_s25, %s412_s3 }
 0x129   :  { %p310_p3 = pnand %p308_p2, %p305_p1 }
 0x12b   :  { %313 = shalt.err (!%p310_p3)
}
 0x12c   :  { %177 = dma.vmem_to_hbm [thread:$0]  %s175_s2, 128, %s412_s3, [#allocation9]  }
 0x12d   :  { %318 = dma.done.wait [#allocation4], 128  }
 0x12e   :  { %319 = vsyncadd [#allocation4], 4294967168 }
 0x12f   :  { %320 = dma.done.wait [#allocation9], 128  }
 0x130   :  { %321 = vsyncadd [#allocation9], 4294967168 }
 0x131   :  { %184 = vsyncpa [#allocation3], 1 }
 0x132   :  { %185 = vsyncpa [#allocation6], 1 }
 0x133   :  { %186 = vsyncpa [#allocation4], 1 }
 0x134   :  { %187 = vsyncpa [#allocation9], 1 }

</bundles_post_ra>
